<compile_context>
chip_gen: v5e
topology: v5e:2x2
jax: 0.10.0
libtpu: 0.0.40
codegen_flags: <defaults>
</compile_context>

<pallas_src>
import jax
import jax.numpy as jnp
from jax.experimental import pallas as pl
from jax.experimental.pallas import tpu as pltpu

_NUM_FFT_FRAME_LENGTHS = 3
_NUM_MEL_BANDS = 80
_FEAT = _NUM_MEL_BANDS * _NUM_FFT_FRAME_LENGTHS   # 240
_ROW_GROUP = 8                                    # 8 rows * 240 = 1920 = 15 * 128 lanes
_WIDE = _ROW_GROUP * _FEAT                        # 1920
_TARGET_BLOCK_BYTES = 4 * 1024 * 1024             # ~4 MB blocks: ~85% of HBM roofline
_VMEM_LIMIT_BYTES = 32 * 1024 * 1024              # covers v5e's 16 MiB default; <= v7x 64 MiB


def _normalize_kernel(x_ref, params_ref, o_ref):
    # x_ref / o_ref: (tile, W); params_ref: (2, W) resident block where
    # row 0 = mean and row 1 = 1/std, broadcast over the row dimension.
    o_ref[...] = (x_ref[...] - params_ref[0:1, :]) * params_ref[1:2, :]


def _choose_tile(n_rows: int, row_bytes: int) -> int:
    """Block row dim: fill ~4 MB blocks; keep the grid even for v7x megacore."""
    target = max(8, (_TARGET_BLOCK_BYTES // row_bytes) // 8 * 8)
    if n_rows <= target:
        return n_rows                      # single block == full array dim (always legal)
    grid = -(-n_rows // target)
    if grid % 2:
        grid += 1                          # even step count -> balanced 2-TC split on v7x
    tile = -(-n_rows // grid)
    tile = ((tile + 7) // 8) * 8           # sublane-aligned block row dim
    return min(tile, n_rows)


def _run(x2, params, n_rows, width):
    tile = _choose_tile(n_rows, width * 4)
    grid = -(-n_rows // tile)
    n_elems = n_rows * width
    return pl.pallas_call(
        _normalize_kernel,
        out_shape=jax.ShapeDtypeStruct((n_rows, width), x2.dtype),
        grid_spec=pltpu.PrefetchScalarGridSpec(
            num_scalar_prefetch=0,
            grid=(grid,),
            in_specs=[
                pl.BlockSpec((tile, width), lambda i: (i, 0)),
                pl.BlockSpec((2, width), lambda i: (0, 0)),   # resident params
            ],
            out_specs=pl.BlockSpec((tile, width), lambda i: (i, 0)),
        ),
        compiler_params=pltpu.CompilerParams(
            dimension_semantics=("parallel",),
            vmem_limit_bytes=_VMEM_LIMIT_BYTES),
        cost_estimate=pl.CostEstimate(
            flops=2 * n_elems,
            transcendentals=0,
            bytes_accessed=8 * n_elems + 2 * width * 4),
    )(x2, params)


@jax.jit
def spectrogram_normalize(x, mean, std):
    """x: [B, F, 80, 3] float32; mean/std: [80, 3] float32 -> [B, F, 80, 3]."""
    B, F, M, L = x.shape
    assert (M, L) == (_NUM_MEL_BANDS, _NUM_FFT_FRAME_LENGTHS)
    rows = B * F

    mean_f = mean.reshape(1, _FEAT)
    inv_std_f = (1.0 / std).reshape(1, _FEAT)

    if rows % _ROW_GROUP == 0:
        # Packed 1920-lane layout; reshapes of a contiguous array are
        # metadata-only (no extra HBM pass).
        n_sr = rows // _ROW_GROUP
        x2 = x.reshape(n_sr, _WIDE)
        params = jnp.concatenate(
            [jnp.tile(mean_f, (1, _ROW_GROUP)),
             jnp.tile(inv_std_f, (1, _ROW_GROUP))], axis=0)     # (2, 1920)
        out = _run(x2, params, n_sr, _WIDE)
    else:
        # Ragged row count: run directly on (rows, 240) — no full-array pad or
        # trailing slice copy.  240 == full last dim, so the block is legal.
        x2 = x.reshape(rows, _FEAT)
        params = jnp.concatenate([mean_f, inv_std_f], axis=0)   # (2, 240)
        out = _run(x2, params, rows, _FEAT)

    return out.reshape(B, F, M, L)


def _check(B, F, key):
    k_x, k_mean, k_std = jax.random.split(key, 3)
    x = jax.random.normal(k_x, (B, F, _NUM_MEL_BANDS, _NUM_FFT_FRAME_LENGTHS),
                          dtype=jnp.float32)
    mean = jax.random.normal(
        k_mean, (_NUM_MEL_BANDS, _NUM_FFT_FRAME_LENGTHS), dtype=jnp.float32)
    std = jax.random.uniform(
        k_std, (_NUM_MEL_BANDS, _NUM_FFT_FRAME_LENGTHS), dtype=jnp.float32,
        minval=0.5, maxval=2.0)

    out = jax.block_until_ready(spectrogram_normalize(x, mean, std))
    ref = (x - mean) / std
    assert out.shape == x.shape
    assert out.dtype == jnp.float32
    # Reciprocal-multiply vs divide differs by ~1 ulp; use a slightly looser rtol.
    assert jnp.allclose(out, ref, atol=1e-5, rtol=1e-5)


if __name__ == "__main__":
    key = jax.random.PRNGKey(0)
    k0, k1, k2 = jax.random.split(key, 3)

    # Small shape consistent with the module's forward:
    # [batch_size=2, num_frames=8, num_mel_bands=80, num_fft_frame_lengths=3]
    _check(2, 8, k0)
    # Non-multiple-of-8 row count: exercises the pad-free ragged (rows, 240) path.
    _check(3, 5, k1)
    # Medium shape: exercises the multi-step (even) grid in the packed layout.
    _check(8, 560, k2)

    print("KERNEL_OK")
</pallas_src>

<mosaic_0001>
module attributes {stable_mosaic.version = 11 : i64} {
  func.func @_normalize_kernel(%arg0: i32, %arg1: memref<2x1920xf32, #tpu.memory_space<vmem>>, %arg2: memref<2x1920xf32, #tpu.memory_space<vmem>>, %arg3: memref<2x1920xf32, #tpu.memory_space<vmem>>) attributes {dimension_semantics = [#tpu.dimension_semantics<parallel>], iteration_bounds = array<i64: 1>, scalar_prefetch = 0 : i64, scratch_operands = 0 : i64, tpu.core_type = #tpu.core_type<tc>, window_params = [{transform_indices = @transform_0, window_bounds = array<i64: 2, 1920>}, {pipeline_mode = #tpu.pipeline_mode<synchronous>, transform_indices = @transform_1, window_bounds = array<i64: 2, 1920>}, {transform_indices = @transform_2, window_bounds = array<i64: 2, 1920>}]} {
    %c0 = arith.constant 0 : index
    %c0_0 = arith.constant 0 : index
    %0 = vector.load %arg1[%c0, %c0_0] : memref<2x1920xf32, #tpu.memory_space<vmem>>, vector<2x1920xf32>
    %c0_1 = arith.constant 0 : index
    %c0_2 = arith.constant 0 : index
    %1 = vector.load %arg2[%c0_1, %c0_2] : memref<2x1920xf32, #tpu.memory_space<vmem>>, vector<1x1920xf32>
    %2 = vector.broadcast %1 : vector<1x1920xf32> to vector<2x1920xf32>
    %3 = arith.subf %0, %2 : vector<2x1920xf32>
    %c1 = arith.constant 1 : index
    %c0_3 = arith.constant 0 : index
    %4 = vector.load %arg2[%c1, %c0_3] : memref<2x1920xf32, #tpu.memory_space<vmem>>, vector<1x1920xf32>
    %5 = vector.broadcast %4 : vector<1x1920xf32> to vector<2x1920xf32>
    %6 = arith.mulf %3, %5 : vector<2x1920xf32>
    %c0_4 = arith.constant 0 : index
    %c0_5 = arith.constant 0 : index
    %7 = vector.load %arg3[%c0_4, %c0_5] : memref<2x1920xf32, #tpu.memory_space<vmem>>, vector<2x1920xf32>
    tpu.vector_store %arg3[%c0_4, %c0_5], %6 {strides = array<i32>} : memref<2x1920xf32, #tpu.memory_space<vmem>>, vector<2x1920xf32>,
    return
  }
  func.func @transform_0(%arg0: i32) -> (i32, i32) {
    %c0_i32 = arith.constant 0 : i32
    %c0_i32_0 = arith.constant 0 : i32
    return %arg0, %c0_i32 : i32, i32
  }
  func.func @transform_1(%arg0: i32) -> (i32, i32) {
    %c0_i32 = arith.constant 0 : i32
    %c0_i32_0 = arith.constant 0 : i32
    %c0_i32_1 = arith.constant 0 : i32
    return %c0_i32, %c0_i32_0 : i32, i32
  }
  func.func @transform_2(%arg0: i32) -> (i32, i32) {
    %c0_i32 = arith.constant 0 : i32
    %c0_i32_0 = arith.constant 0 : i32
    return %arg0, %c0_i32 : i32, i32
  }
}

</mosaic_0001>

<bundles_post_ra>
// kernel: spectrogram_normalize.1
= control target key start
LH: loop header
LB: loop body
LE: loop exit
PB: predicated region body
PF: predicated region fallthrough
CT: control target
= control target key end

     0   :  { %vm46_vm0 = vcmask 1041408   ;;  %vm48_vm1 = vcmask 1045508   ;;  %vm50_vm2 = vcmask 1043456   ;;  %s203_s1 = inlined_call_operand.vmem [shape: f32[2,1920], index: 1, kind: input, shape index: {}]   ;;  %s204_s0 = inlined_call_operand.vmem [shape: f32[2,1920], index: 0, kind: input, shape index: {}]   ;;  %s205_s2 = inlined_call_operand.vmem [shape: f32[2,1920], index: 2, kind: output, shape index: {}]  }
   0x1   :  { %v15_v0 = vld [vmem:[%s203_s1] ss:$2 sm:$0xff]  ;;  %v128_v1 = vld [vmem:[%s203_s1 + $0x1] ss:$2 sm:$0xff]  ;;  %v127_v31 = vld [vmem:[%s203_s1 + $0x10] ss:$2 sm:$0xff] }
   0x2   :  { %v20_v2 = vperm.slane %v15_v0, 0  ;;  %v21_v3 = vperm.slane %v15_v0, 1  ;;  %v22_v4 = vperm.slane %v15_v0, 2  ;;  %v23_v5 = vperm.slane %v15_v0, 3  ;;  %v11_v14 = vld [vmem:[%s204_s0] sm:$0xff]  ;;  %v12_v32 = vld [vmem:[%s204_s0 + $0x8] sm:$0xff] }
   0x3   :  { %v74_v6 = vperm.slane %v128_v1, 0  ;;  %v75_v7 = vperm.slane %v128_v1, 1  ;;  %v76_v8 = vperm.slane %v128_v1, 2  ;;  %v77_v9 = vperm.slane %v128_v1, 3  ;;  %v129_v41 = vld [vmem:[%s203_s1 + $0x11] ss:$2 sm:$0xff] }
   0x4   :  { %v35_v10 = vrot.slane %v21_v3, 6  ;;  %v36_v11 = vrot.slane %v22_v4, 4  ;;  %v37_v12 = vrot.slane %v23_v5, 2  ;;  %v24_v13 = vperm.slane %v15_v0, 4  ;;  %v13_v59 = vld [vmem:[%s204_s0 + $0x10] sm:$0xff] }
   0x5   :  { %v89_v15 = vrot.slane %v75_v7, 6  ;;  %v90_v16 = vrot.slane %v76_v8, 4  ;;  %v91_v17 = vrot.slane %v77_v9, 2  ;;  %v25_v18 = vperm.slane %v15_v0, 5 }
   0x6   :  { %v47_v19 = vsel %vm46_vm0, %v20_v2, %v35_v10  ;;  %v49_v20 = vsel %vm48_vm1, %v36_v11, %v37_v12  ;;  %v26_v21 = vperm.slane %v15_v0, 6  ;;  %v27_v22 = vperm.slane %v15_v0, 7 }
   0x7   :  { %v51_v23 = vsel %vm50_vm2, %v47_v19, %v49_v20  ;;  %v100_v24 = vsel %vm46_vm0, %v74_v6, %v89_v15  ;;  %v101_v25 = vsel %vm48_vm1, %v90_v16, %v91_v17  ;;  %v38_v26 = vrot.slane %v25_v18, 6  ;;  %v14_v15 = vld [vmem:[%s204_s0 + $0x18] sm:$0x3f] }
   0x8   :  { %v64_v27 = vsub.f32 %v11_v14, %v51_v23  ;;  %v102_v28 = vsel %vm50_vm2, %v100_v24, %v101_v25  ;;  %v39_v29 = vrot.slane %v26_v21, 4  ;;  %v40_v30 = vrot.slane %v27_v22, 2 }
   0x9   :  { %v52_v33 = vsel %vm46_vm0, %v24_v13, %v38_v26  ;;  %v78_v34 = vperm.slane %v128_v1, 4  ;;  %v79_v35 = vperm.slane %v128_v1, 5  ;;  %v80_v36 = vperm.slane %v128_v1, 6 }
   0xa   :  { %v115_v37 = vmul.f32 %v102_v28, %v64_v27  ;;  %v53_v38 = vsel %vm48_vm1, %v39_v29, %v40_v30  ;;  %v81_v39 = vperm.slane %v128_v1, 7  ;;  %v28_v40 = vperm.slane %v127_v31, 0 }
   0xb   :  { %v54_v42 = vsel %vm50_vm2, %v52_v33, %v53_v38  ;;  %v92_v43 = vrot.slane %v79_v35, 6  ;;  %v93_v44 = vrot.slane %v80_v36, 4  ;;  %v29_v45 = vperm.slane %v127_v31, 1 }
   0xc   :  { %119 = vst [vmem:[%s205_s2] sm:$0xff] %v115_v37  ;;  %v65_v46 = vsub.f32 %v12_v32, %v54_v42  ;;  %v94_v47 = vrot.slane %v81_v39, 2  ;;  %v30_v48 = vperm.slane %v127_v31, 2  ;;  %v31_v49 = vperm.slane %v127_v31, 3 }
   0xd   :  { %v103_v50 = vsel %vm46_vm0, %v78_v34, %v92_v43  ;;  %v41_v51 = vrot.slane %v29_v45, 6  ;;  %v82_v52 = vperm.slane %v129_v41, 0  ;;  %v83_v53 = vperm.slane %v129_v41, 1 }
   0xe   :  { %v104_v54 = vsel %vm48_vm1, %v93_v44, %v94_v47  ;;  %v42_v55 = vrot.slane %v30_v48, 4  ;;  %v43_v56 = vrot.slane %v31_v49, 2  ;;  %v84_v57 = vperm.slane %v129_v41, 2 }
   0xf   :  { %v105_v58 = vsel %vm50_vm2, %v103_v50, %v104_v54  ;;  %v55_v60 = vsel %vm46_vm0, %v28_v40, %v41_v51  ;;  %v85_v61 = vperm.slane %v129_v41, 3  ;;  %v95_v62 = vrot.slane %v83_v53, 6 }
  0x10   :  { %v116_v63 = vmul.f32 %v105_v58, %v65_v46  ;;  %v56_v0 = vsel %vm48_vm1, %v42_v55, %v43_v56  ;;  %v96_v1 = vrot.slane %v84_v57, 4  ;;  %v32_v2 = vperm.slane %v127_v31, 4 }
  0x11   :  { %v57_v3 = vsel %vm50_vm2, %v55_v60, %v56_v0  ;;  %v97_v4 = vrot.slane %v85_v61, 2  ;;  %v106_v5 = vsel %vm46_vm0, %v82_v52, %v95_v62  ;;  %v33_v6 = vperm.slane %v127_v31, 5 }
  0x12   :  { %120 = vst [vmem:[%s205_s2 + $0x8] sm:$0xff] %v116_v63  ;;  %v66_v7 = vsub.f32 %v13_v59, %v57_v3  ;;  %v34_v8 = vperm.slane %v127_v31, 6  ;;  %v86_v9 = vperm.slane %v129_v41, 4  ;;  %v87_v10 = vperm.slane %v129_v41, 5 }
  0x13   :  { %v107_v11 = vsel %vm48_vm1, %v96_v1, %v97_v4  ;;  %v44_v12 = vrot.slane %v33_v6, 6  ;;  %v88_v13 = vperm.slane %v129_v41, 6 }
  0x14   :  { %v108_v14 = vsel %vm50_vm2, %v106_v5, %v107_v11  ;;  %v45_v16 = vrot.slane %v34_v8, 4  ;;  %v98_v17 = vrot.slane %v87_v10, 6 }
  0x15   :  { %v117_v18 = vmul.f32 %v108_v14, %v66_v7  ;;  %v58_v19 = vsel %vm46_vm0, %v32_v2, %v44_v12  ;;  %v99_v20 = vrot.slane %v88_v13, 4 }
  0x16   :  { %v59_v21 = vsel %vm50_vm2, %v58_v19, %v45_v16  ;;  %v109_v22 = vsel %vm46_vm0, %v86_v9, %v98_v17 }
  0x17   :  { %121 = vst [vmem:[%s205_s2 + $0x10] sm:$0xff] %v117_v18  ;;  %v67_v23 = vsub.f32 %v14_v15, %v59_v21  ;;  %v110_v24 = vsel %vm50_vm2, %v109_v22, %v99_v20 }
  0x19   :  { %v118_v25 = vmul.f32 %v110_v24, %v67_v23 }
  0x1b   :  { %122 = vst [vmem:[%s205_s2 + $0x18] sm:$0x3f] %v118_v25 }

</bundles_post_ra>
